<compile_context>
chip_gen: v7x
topology: tpu7x:2x2x1
jax: 0.10.0
libtpu: 0.0.40
codegen_flags: <defaults>
</compile_context>

<pallas_src>
import math
import functools

import jax
import jax.numpy as jnp
from jax.experimental import pallas as pl
from jax.experimental.pallas import tpu as pltpu


# ---------------------------------------------------------------------------
# Buffer construction: deterministic, mirrors the torch loop
#   pe[pos, i]     = sin(pos / 10000 ** (2 * i       / embed_dim))
#   pe[pos, i + 1] = cos(pos / 10000 ** (2 * (i + 1) / embed_dim))
# ---------------------------------------------------------------------------
def build_positional_encoding(max_seq_len: int, embed_dim: int) -> jnp.ndarray:
    assert embed_dim % 2 == 0
    pos = jnp.arange(max_seq_len, dtype=jnp.float32)[:, None]          # (S, 1)
    i_even = jnp.arange(0, embed_dim, 2, dtype=jnp.float32)[None, :]   # (1, D/2)

    denom_sin = jnp.power(10000.0, 2.0 * i_even / embed_dim)           # even cols
    denom_cos = jnp.power(10000.0, 2.0 * (i_even + 1.0) / embed_dim)   # odd cols

    pe_even = jnp.sin(pos / denom_sin)                                 # (S, D/2)
    pe_odd = jnp.cos(pos / denom_cos)                                  # (S, D/2)

    # interleave: columns [0,2,4,...] = sin, [1,3,5,...] = cos
    pe = jnp.stack([pe_even, pe_odd], axis=-1).reshape(max_seq_len, embed_dim)
    return pe.astype(jnp.float32)


# ---------------------------------------------------------------------------
# Kernel body: out = x * sqrt(embed_dim) + pe      (math in f32 for parity)
# x_ref / o_ref: (TS, D_eff) tile for one batch element, one sequence chunk.
# pe_ref:        (TS, D_eff) float32 tile (same chunk for every batch element).
# ---------------------------------------------------------------------------
def _pos_embed_kernel(x_ref, pe_ref, o_ref, *, scale):
    x = x_ref[...].astype(jnp.float32)
    o_ref[...] = (x * scale + pe_ref[...]).astype(o_ref.dtype)


def _lane_pack_factor(S: int, D: int, target: int = 512) -> int:
    """Fold k sequence rows into the lane axis so k*D is a multiple of 128.

    Requires S % k == 0 (pe reshapes identically, op is elementwise, so the
    result is bit-identical).  Prefer the smallest k with k*D >= target so the
    packed sequence axis stays long enough to tile."""
    if D % 128 == 0 or S <= 1:
        return 1
    for k in range(2, S + 1):
        if S % k == 0 and (k * D) % 128 == 0 and k * D >= target:
            return k
    for k in range(2, S + 1):
        if S % k == 0 and (k * D) % 128 == 0:
            return k
    return 1  # no valid fold; run lane-sparse (correct, just slower)


def _choose_seq_tile(S: int, B: int, D_eff: int, x_itemsize: int,
                     budget_bytes: int = 24 * 1024 * 1024,
                     min_steps: int = 8) -> int:
    """Sequence-tile rows: multiple of 8, working set (2x x + 2x out + 2x pe)
    under `budget_bytes`, and small enough that num_s * B >= min_steps and
    num_s >= 2 (pipelining + v7x megacore split).  Grid uses cdiv, so ts does
    not need to divide S."""
    if S <= 8:
        return S
    per_row = (2 * x_itemsize + 4) * D_eff * 2        # x, out (x dtype) + pe (f32), double-buffered
    max_rows = max(8, budget_bytes // per_row)
    want_num_s = max(2, -(-min_steps // max(B, 1)))   # ceil(min_steps / B), >= 2
    ts_cap = -(-S // want_num_s)                      # ceil(S / want_num_s)
    ts = min(max_rows, ts_cap, S)
    ts = max(8, (ts // 8) * 8)                        # round down to a multiple of 8
    return ts


def positional_embedding(x: jnp.ndarray, pe_full: jnp.ndarray, *,
                         donate_x: bool = False) -> jnp.ndarray:
    """x: (B, S, D).  pe_full: (max_seq_len, D) float32."""
    B, S, D = x.shape
    if S > pe_full.shape[0]:
        raise ValueError(f"seq_len {S} exceeds max_seq_len {pe_full.shape[0]}")

    scale = math.sqrt(D)                      # scale uses the ORIGINAL embed_dim
    pe = pe_full[:S, :].astype(jnp.float32)   # keep fp32 for torch parity

    # Lane-dense packing when D is not a multiple of 128.
    k = _lane_pack_factor(S, D)
    S_eff, D_eff = S // k, k * D
    x_eff = x.reshape(B, S_eff, D_eff)
    pe_eff = pe.reshape(S_eff, D_eff)

    ts = _choose_seq_tile(S_eff, B, D_eff, jnp.dtype(x.dtype).itemsize)
    num_s = pl.cdiv(S_eff, ts)                # ragged last block handled by Pallas

    kernel = functools.partial(_pos_embed_kernel, scale=scale)

    out = pl.pallas_call(
        kernel,
        out_shape=jax.ShapeDtypeStruct((B, S_eff, D_eff), x.dtype),
        grid_spec=pltpu.PrefetchScalarGridSpec(
            num_scalar_prefetch=0,
            # B innermost: pe's block index is constant across the batch loop,
            # so its re-DMA is skipped for consecutive steps.
            grid=(num_s, B),
            in_specs=[
                pl.BlockSpec((pl.Squeezed(), ts, D_eff), lambda s, b: (b, s, 0)),  # x
                pl.BlockSpec((ts, D_eff), lambda s, b: (s, 0)),                    # pe
            ],
            out_specs=pl.BlockSpec((pl.Squeezed(), ts, D_eff), lambda s, b: (b, s, 0)),
        ),
        compiler_params=pltpu.CompilerParams(
            dimension_semantics=("parallel", "parallel"),
            vmem_limit_bytes=40 * 1024 * 1024,   # v7x-safe (64 MiB physical/TC)
        ),
        input_output_aliases=({0: 0} if donate_x else {}),
    )(x_eff, pe_eff)

    return out.reshape(B, S, D)


# ---------------------------------------------------------------------------
# Pure-JAX reference for correctness checking.
# ---------------------------------------------------------------------------
def positional_embedding_ref(x, pe_full):
    S = x.shape[1]
    out = x.astype(jnp.float32) * math.sqrt(x.shape[-1]) + pe_full[None, :S, :]
    return out.astype(x.dtype)


if __name__ == "__main__":
    key = jax.random.PRNGKey(0)

    # Test 1: small shapes consistent with the module (exercises lane packing:
    # D=32 -> k=4 fold to lane width 128).
    batch, seq, embed_dim, max_seq_len = 2, 8, 32, 16
    x1 = jax.random.uniform(key, (batch, seq, embed_dim), dtype=jnp.float32)
    pe1 = build_positional_encoding(max_seq_len, embed_dim)
    out1 = jax.block_until_ready(positional_embedding(x1, pe1))
    ref1 = positional_embedding_ref(x1, pe1)
    assert out1.shape == (batch, seq, embed_dim)
    assert jnp.allclose(out1, ref1, atol=1e-5, rtol=1e-5), "mismatch vs reference (test 1)"

    # Test 2: lane-dense D with a ragged sequence tiling (S=12, ts=8 -> cdiv grid).
    x2 = jax.random.uniform(jax.random.PRNGKey(1), (1, 12, 128), dtype=jnp.float32)
    pe2 = build_positional_encoding(16, 128)
    out2 = jax.block_until_ready(positional_embedding(x2, pe2))
    ref2 = positional_embedding_ref(x2, pe2)
    assert out2.shape == (1, 12, 128)
    assert jnp.allclose(out2, ref2, atol=1e-5, rtol=1e-5), "mismatch vs reference (test 2)"

    print("KERNEL_OK")
</pallas_src>

<mosaic_0001>
module attributes {stable_mosaic.version = 11 : i64} {
  func.func @_pos_embed_kernel(%arg0: i32, %arg1: i32, %arg2: memref<1x2x128xf32, #tpu.memory_space<vmem>>, %arg3: memref<2x128xf32, #tpu.memory_space<vmem>>, %arg4: memref<1x2x128xf32, #tpu.memory_space<vmem>>) attributes {dimension_semantics = [#tpu.dimension_semantics<parallel>, #tpu.dimension_semantics<parallel>], iteration_bounds = array<i64: 1, 2>, scalar_prefetch = 0 : i64, scratch_operands = 0 : i64, tpu.core_type = #tpu.core_type<tc>, window_params = [{transform_indices = @transform_0, window_bounds = array<i64: 1, 2, 128>}, {transform_indices = @transform_1, window_bounds = array<i64: 2, 128>}, {transform_indices = @transform_2, window_bounds = array<i64: 1, 2, 128>}]} {
    %c0 = arith.constant 0 : index
    %c0_0 = arith.constant 0 : index
    %c0_1 = arith.constant 0 : index
    %0 = vector.load %arg2[%c0, %c0_0, %c0_1] : memref<1x2x128xf32, #tpu.memory_space<vmem>>, vector<1x2x128xf32>
    %1 = vector.shape_cast %0 : vector<1x2x128xf32> to vector<2x128xf32>
    %cst = arith.constant 5.65685415 : f32
    %2 = vector.broadcast %cst : f32 to vector<2x128xf32>
    %3 = arith.mulf %1, %2 : vector<2x128xf32>
    %c0_2 = arith.constant 0 : index
    %c0_3 = arith.constant 0 : index
    %4 = vector.load %arg3[%c0_2, %c0_3] : memref<2x128xf32, #tpu.memory_space<vmem>>, vector<2x128xf32>
    %5 = arith.addf %3, %4 : vector<2x128xf32>
    %c0_4 = arith.constant 0 : index
    %c0_5 = arith.constant 0 : index
    %c0_6 = arith.constant 0 : index
    %6 = vector.load %arg4[%c0_4, %c0_5, %c0_6] : memref<1x2x128xf32, #tpu.memory_space<vmem>>, vector<1x2x128xf32>
    %7 = vector.shape_cast %6 : vector<1x2x128xf32> to vector<2x128xf32>
    %8 = vector.shape_cast %5 : vector<2x128xf32> to vector<1x2x128xf32>
    tpu.vector_store %arg4[%c0_4, %c0_5, %c0_6], %8 {strides = array<i32>} : memref<1x2x128xf32, #tpu.memory_space<vmem>>, vector<1x2x128xf32>,
    return
  }
  func.func @transform_0(%arg0: i32, %arg1: i32) -> (i32, i32, i32) {
    %c0_i32 = arith.constant 0 : i32
    %c0_i32_0 = arith.constant 0 : i32
    return %arg1, %arg0, %c0_i32 : i32, i32, i32
  }
  func.func @transform_1(%arg0: i32, %arg1: i32) -> (i32, i32) {
    %c0_i32 = arith.constant 0 : i32
    %c0_i32_0 = arith.constant 0 : i32
    return %arg0, %c0_i32 : i32, i32
  }
  func.func @transform_2(%arg0: i32, %arg1: i32) -> (i32, i32, i32) {
    %c0_i32 = arith.constant 0 : i32
    %c0_i32_0 = arith.constant 0 : i32
    return %arg1, %arg0, %c0_i32 : i32, i32, i32
  }
}

</mosaic_0001>

<bundles_post_ra>
// kernel: tpu_custom_call.1
= control target key start
LH: loop header
LB: loop body
LE: loop exit
PB: predicated region body
PF: predicated region fallthrough
CT: control target
= control target key end

     0   :  { %7 = vsyncpa [#allocation3], 0  ;;  %s690_s0 = inlined_call_operand.hbm [shape: f32[2,2,128], index: 0, kind: input, shape index: {}]   ;;  %s691_s1 = inlined_call_operand.vmem [shape: f32[2,128], index: 1, kind: input, shape index: {}]   ;;  %s692_s2 = inlined_call_operand.hbm [shape: f32[2,2,128], index: 2, kind: output, shape index: {}]  }
   0x1   :  { %9 = vsyncpa [#allocation3 + $0x1], 0 }
   0x2   :  { %10 = vsyncpa [#allocation4], 0 }
   0x3   :  { %12 = vsyncpa [#allocation4 + $0x1], 0  ;;  %s515_s9 = smov 0   ;;  %s517_s10 = smov 0  }
   0x4   :  { %s519_s11 = smov 0   ;;  %s521_s12 = smov 0  }
   0x5   :  { %s523_s13 = smov 0   ;;  %s525_s14 = smov 0  }
   0x6 LB: > { %s308_s15 = sadd.s32 4294967295, %s496_s14   ;;  %s309_s16 = sadd.s32 4294967294, %s496_s14   ;;  %s496_s14 = sphi %s525_s14, %s18_s14   ;;  %s492_s13 = sphi %s523_s13, %s708_s13   ;;  %s488_s12 = sphi %s521_s12, %s707_s12   ;;  %s484_s11 = sphi %s519_s11, %s706_s11   ;;  %s480_s10 = sphi %s517_s10, %s705_s10   ;;  %s476_s9 = sphi %s515_s9, %s704_s9  }
   0x7   : > { %s27_s17 = sadd.s32 1, %s492_s13  ;;  %s39_s18 = sadd.s32 1, %s484_s11 }
   0x8   : > { %p28_p0 = scmp.ge.s32.totalorder %s27_s17, 2  ;;  %p46_p1 = scmp.ne.s32.totalorder %s484_s11, %s480_s10 }
   0x9   : > { %p47_p2 = scmp.eq.s32.totalorder %s496_s14, 0  ;;  %p52_p3 = scmp.ne.s32.totalorder %s480_s10, %s476_s9 }
   0xa   : > { %s710_s17 = smov (%p28_p0, %s27_s17), 0  ;;  %p53_p5 = scmp.eq.s32.totalorder %s308_s15, 0 }
   0xb   : > { %p556_p4 = por %p47_p2, %p46_p1  ;;  %s34_s20 = ssub.s32 %s492_s13, %s710_s17 }
   0xc   : > { %p104_p6 = scmp.eq.s32.totalorder %s308_s15, 1  ;;  %p37_p7 = scmp.eq.s32.totalorder %s34_s20, 0 }
   0xd   : > { %p562_p8 = por %p53_p5, %p52_p3  ;;  %p110_p10 = scmp.eq.s32.totalorder %s309_s16, 1 }
   0xe   : > { %p566_p9 = por %p104_p6, %p46_p1  ;;  %p334_p13 = scmp.lt.s32.totalorder %s496_s14, 2 }
   0xf   : > { %s571_s23 = scalar_select %p37_p7, %s484_s11, %s39_s18  }
  0x10   : > { %s696_s22 = scalar_select %p566_p9, 1, 0 }
  0x11   : > { %p573_p11 = por %p110_p10, %p52_p3  ;;  %s137_s25 = sand.u32 1, %s484_s11  }
  0x12   : > { %s313_s26 = sshll.u32 %s137_s25, 1  ;;  %s314_s27 = sshll.u32 %s492_s13, 5 }
  0x13   : > { %s697_s24 = scalar_select %p573_p11, 1, 0 }
  0x14   : > { %s584_s30 = scalar_lea.hbm %s690_s0, %s314_s27  ;;  %s141_s3 = scalar_lea.vmem [#allocation2], %s313_s26 }
  0x15   : > { %s149_s4 = sshll.u32 %s141_s3, 4  ;;  %p590_p0 = pnand %p334_p13, %p556_p4  ;;  %s586_s4 = int_to_ptr.vmem [resolvable:$true] %s149_s4 }
  0x16   : > { %s138_s6 = scalar_lea.sflag [#allocation3], %s137_s25  ;;  %s384_s7 = scalar_lea.hbm %s584_s30, 32 }
  0x17   : > { %p385_p3 = scmp.ne.s32.totalorder %s584_s30, %s384_s7  ;;  %p386_p5 = pneg %p590_p0 }
  0x18   : > { %s389_s16 = scalar_lea.hbm %s690_s0, 64  ;;  %p390_p4 = scmp.lt.u32.totalorder %s584_s30, %s690_s0 }
  0x19   : > { %p387_p6 = pnand %p386_p5, %p385_p3  ;;  %p391_p10 = scmp.lt.u32.totalorder %s389_s16, %s384_s7 }
  0x1a   : > { %p393_p12 = scmp.lt.u32.totalorder %s384_s7, %s584_s30 }
  0x1b   : > { %p388_p7 = pneg %p387_p6  ;;  %p392_p13 = por %p391_p10, %p390_p4 }
  0x1d   : > { %p394_p1 = por %p393_p12, %p392_p13 }
  0x1f   : > { %p395_p2 = pnand %p394_p1, %p388_p7 }
  0x21   : > { %398 = shalt.err (!%p395_p2)
}
  0x22   : > { %s399_s20 = scalar_lea.vmem %s586_s4, 32  ;;  %s498_s25 = smov [#allocation2]  }
  0x23   : > { %p400_p3 = scmp.ne.s32.totalorder %s586_s4, %s399_s20  ;;  %s404_s26 = sshll.u32 %s498_s25, 4  ;;  %s405_s26 = int_to_ptr.vmem [resolvable:$false] %s404_s26 }
  0x24   : > { %s406_s27 = scalar_lea.vmem %s405_s26, 64  ;;  %p407_p9 = scmp.lt.s32.totalorder %s586_s4, %s405_s26 }
  0x25   : > { %p402_p6 = pnand %p400_p3, %p386_p5  ;;  %p408_p4 = scmp.lt.s32.totalorder %s406_s27, %s399_s20 }
  0x27   : > { %p403_p11 = pneg %p402_p6  ;;  %p409_p10 = por %p408_p4, %p407_p9 }
  0x29   : > { %p410_p12 = pnand %p409_p10, %p403_p11 }
  0x2b   : > { %413 = shalt.err (!%p410_p12)
}
  0x2c   : > { %329 = dma.hbm_to_vmem [thread:$0]  (!%p590_p0), %s584_s30, 32, %s586_s4, %s138_s6  }
  0x2d   : > { %p699_p1 = scmp.lt.s32.totalorder %s496_s14, 3  ;;  %p700_p2 = scmp.ge.s32.totalorder %s496_s14, 1 }
  0x2f   : > { %p155_p5 = pnand %p700_p2, %p699_p1 }
  0x30   : > { %s626_s28 = sand.u32 (!%p155_p5), 1, %s480_s10  }
  0x31   : > { %158 = sbr.rel (%p155_p5) target bundleno = 83 (0x53), region = 28  ;;  %s316_s29 = sshll.u32 (!%p155_p5), %s626_s28, 1 }
  0x32   : > { %s161_s3 = scalar_lea.sflag (!%p155_p5), [#allocation3], %s626_s28  ;;  %s164_s7 = scalar_lea.vmem (!%p155_p5), [#allocation2], %s316_s29 }
  0x38   : > { %467 = dma.done.wait (%p562_p8), %s161_s3, 32  }
  0x39   : > { %469 = vsyncadd (%p562_p8), %s161_s3, 4294967264  ;;  %v193_v0 = vld [vmem:[%s164_s7] sm:$0x3]  ;;  %s188_s5 = scalar_lea.vmem [#allocation5], %s316_s29  ;;  %s319_s8 = sshll.u32 %s488_s12, 5 }
  0x3a   : > { %v195_v1 = vld [vmem:[%s691_s1] sm:$0x3]  ;;  %s213_s6 = sshll.u32 %s188_s5, 4  ;;  %v194_v2 = vmul.f32 5.656854, %v193_v0  ;;  %s643_s21 = scalar_lea.hbm %s692_s2, %s319_s8  ;;  %s638_s6 = int_to_ptr.vmem [resolvable:$true] %s213_s6 }
  0x3b   : > { %s199_s18 = scalar_lea.sflag [#allocation4], %s626_s28  ;;  %s414_s19 = scalar_lea.vmem %s638_s6, 32 }
  0x3c   : > { %v196_v3 = vadd.f32 %v195_v1, %v194_v2  ;;  %p415_p8 = scmp.ne.s32.totalorder %s638_s6, %s414_s19  ;;  %p701_p9 = scmp.ne.s32.totalorder %s696_s22, 0 }
  0x3d   : > { %s499_s12 = smov [#allocation5]  }
  0x3e   : > { %197 = vst [vmem:[%s188_s5] sm:$0x3] %v196_v3  ;;  %p416_p11 = pnand %p415_p8, %p701_p9  ;;  %s418_s20 = sshll.u32 %s499_s12, 4  ;;  %s419_s20 = int_to_ptr.vmem [resolvable:$false] %s418_s20 }
  0x3f   : > { %s420_s25 = scalar_lea.vmem %s419_s20, 64  ;;  %p421_p7 = scmp.lt.s32.totalorder %s638_s6, %s419_s20 }
  0x40   : > { %p417_p0 = pneg %p416_p11  ;;  %p422_p13 = scmp.lt.s32.totalorder %s420_s25, %s414_s19 }
  0x42   : > { %p423_p3 = por %p422_p13, %p421_p7 }
  0x44   : > { %p424_p6 = pnand %p423_p3, %p417_p0 }
  0x46   : > { %427 = shalt.err (!%p424_p6)
}
  0x47   : > { %s428_s26 = scalar_lea.hbm %s643_s21, 32  ;;  %s432_s29 = scalar_lea.hbm %s692_s2, 64 }
  0x48   : > { %p429_p4 = scmp.ne.s32.totalorder %s643_s21, %s428_s26  ;;  %p433_p1 = scmp.lt.u32.totalorder %s643_s21, %s692_s2 }
  0x49   : > { %p434_p2 = scmp.lt.u32.totalorder %s432_s29, %s428_s26  ;;  %p436_p8 = scmp.lt.u32.totalorder %s428_s26, %s643_s21 }
  0x4a   : > { %p430_p10 = pnand %p429_p4, %p701_p9 }
  0x4b   : > { %p435_p5 = por %p434_p2, %p433_p1 }
  0x4c   : > { %p431_p12 = pneg %p430_p10 }
  0x4d   : > { %p437_p11 = por %p436_p8, %p435_p5 }
  0x4f   : > { %p438_p0 = pnand %p437_p11, %p431_p12 }
  0x51   : > { %441 = shalt.err (!%p438_p0)
}
  0x52   : > { %324 = dma.vmem_to_hbm [thread:$0]  (%p701_p9), %s638_s6, 32, %s643_s21, %s199_s18  }
  0x53 PF: > { %s225_s30 = sand.u32 1, %s476_s9   ;;  %p702_p7 = scmp.ne.s32.totalorder %s697_s24, 0 }
  0x54   : > { %p703_p13 = scmp.ge.s32.totalorder %s496_s14, 2  ;;  %s226_s4 = scalar_lea.sflag [#allocation4], %s225_s30 }
  0x56   : > { %p331_p3 = pnand %p703_p13, %p702_p7 }
  0x58   : > { %471 = dma.done.wait (!%p331_p3), %s226_s4, 32  }
  0x59   : > { %473 = vsyncadd (!%p331_p3), %s226_s4, 4294967264  ;;  %s18_s14 = sadd.s32 1, %s496_s14   ;;  %s704_s9 = smov %s480_s10 }
  0x5a   : > { %p15_p6 = scmp.ge.s32.totalorder %s18_s14, 4   ;;  %s705_s10 = smov %s484_s11 }
  0x5b   : > { %s706_s11 = smov %s571_s23  ;;  %s707_s12 = smov %s492_s13 }
  0x5c   : > { %s708_s13 = smov %s710_s17  ;;  %17 = sbr.rel (!%p15_p6) target bundleno = 6 (0x6), region = 76 }
  0x63   :  { %231 = vsyncpa [#allocation3], 1 }
  0x64   :  { %233 = vsyncpa [#allocation3 + $0x1], 1 }
  0x65   :  { %234 = vsyncpa [#allocation4], 1 }
  0x66   :  { %236 = vsyncpa [#allocation4 + $0x1], 1 }

</bundles_post_ra>
